<compile_context>
chip_gen: v5e
topology: v5e:2x2
jax: 0.10.0
libtpu: 0.0.40
codegen_flags: <defaults>
</compile_context>

<pallas_src>
import math

import jax
import jax.numpy as jnp
from jax.experimental import pallas as pl
from jax.experimental.pallas import tpu as pltpu

HIDDEN = 256
LANE = 128                                  # lane width -> lane-dense padded fc3
_TB_BUCKETS = (8, 16, 32, 64, 128, 256, 512, 1024)   # fixed set: stable compiles
TB_MAX = _TB_BUCKETS[-1]


def dqn_kernel(x_ref, w1_ref, b1_ref, w2_ref, b2_ref, w3_ref, b3_ref, out_ref):
    # fc1 + relu   (bf16 operands into the MXU, f32 accumulate, f32 ReLU)
    x = x_ref[...].astype(jnp.bfloat16)
    h1 = jnp.dot(x, w1_ref[...], preferred_element_type=jnp.float32) + b1_ref[...]
    h1 = jnp.maximum(h1, 0.0).astype(jnp.bfloat16)
    # fc2 + relu
    h2 = jnp.dot(h1, w2_ref[...], preferred_element_type=jnp.float32) + b2_ref[...]
    h2 = jnp.maximum(h2, 0.0).astype(jnp.bfloat16)
    # fc3 (lane-dense padded output, no activation)
    out = jnp.dot(h2, w3_ref[...], preferred_element_type=jnp.float32) + b3_ref[...]
    out_ref[...] = out.astype(out_ref.dtype)


def _tensorcores_per_chip():
    # v7x packs 2 TensorCores per chip; >=2 grid steps lets "parallel" shard
    # the batch across them. v5e/v6e have 1 TC -> prefer a single fat tile.
    try:
        kind = jax.devices()[0].device_kind.lower()
    except Exception:
        return 1
    return 2 if "v7" in kind else 1


def _pick_tb(batch, n_cores):
    # Smallest bucket >= rows-per-core, capped at TB_MAX. Buckets >=16 keep the
    # bf16 output tile on packed-sublane (16-row) boundaries.
    target = min(-(-batch // max(n_cores, 1)), TB_MAX)
    for b in _TB_BUCKETS:
        if b >= target:
            return b
    return TB_MAX


def dqn_forward(x, params, action_size, out_dtype=jnp.bfloat16):
    w1, b1, w2, b2, w3p, b3p = params
    B, S = x.shape
    H = w1.shape[1]
    Np = w3p.shape[1]            # lane-padded output width (multiple of 128)

    tb = _pick_tb(B, _tensorcores_per_chip())
    n_tiles = pl.cdiv(B, tb)     # last tile may be ragged; Pallas masks OOB rows

    resident = dict(pipeline_mode=pl.Buffered(1))   # never changes block index

    flops = 2 * n_tiles * tb * (S * H + H * H + H * Np)
    bytes_accessed = (
        x.size * x.dtype.itemsize
        + sum(int(p.size) * p.dtype.itemsize for p in params)
        + B * Np * jnp.dtype(out_dtype).itemsize
    )

    out = pl.pallas_call(
        dqn_kernel,
        out_shape=jax.ShapeDtypeStruct((B, Np), out_dtype),
        grid=(n_tiles,),
        in_specs=[
            pl.BlockSpec((tb, S), lambda i: (i, 0)),               # x tile (pipelined)
            pl.BlockSpec((S, H), lambda i: (0, 0), **resident),    # w1 (VMEM-resident)
            pl.BlockSpec((1, H), lambda i: (0, 0), **resident),    # b1
            pl.BlockSpec((H, H), lambda i: (0, 0), **resident),    # w2
            pl.BlockSpec((1, H), lambda i: (0, 0), **resident),    # b2
            pl.BlockSpec((H, Np), lambda i: (0, 0), **resident),   # w3 (lane-padded)
            pl.BlockSpec((1, Np), lambda i: (0, 0), **resident),   # b3 (lane-padded)
        ],
        out_specs=pl.BlockSpec((tb, Np), lambda i: (i, 0)),
        compiler_params=pltpu.CompilerParams(
            dimension_semantics=("parallel",),
        ),
        cost_estimate=pl.CostEstimate(
            flops=flops, transcendentals=0, bytes_accessed=bytes_accessed
        ),
    )(x, w1, b1, w2, b2, w3p, b3p)

    # Strip the zero-padded action columns (cheap plumbing; no batch padding
    # to strip since ragged tiles are masked inside the pipeline).
    return out[:, :action_size]


def init_params(key, state_size, action_size, hidden=HIDDEN):
    """PyTorch-Linear-style U(-1/sqrt(fan_in), 1/sqrt(fan_in)) init.

    Weights stored (in, out) in bf16; biases (1, out) in f32. fc3 weight/bias
    are zero-padded to a lane-dense multiple of 128 output columns.
    """
    def linear(key, fan_in, fan_out):
        kw, kb = jax.random.split(key)
        bound = 1.0 / math.sqrt(fan_in)
        w = jax.random.uniform(kw, (fan_in, fan_out), jnp.float32, -bound, bound)
        b = jax.random.uniform(kb, (1, fan_out), jnp.float32, -bound, bound)
        return w.astype(jnp.bfloat16), b

    k1, k2, k3 = jax.random.split(key, 3)
    w1, b1 = linear(k1, state_size, hidden)
    w2, b2 = linear(k2, hidden, hidden)
    w3, b3 = linear(k3, hidden, action_size)

    n_pad = max(LANE, ((action_size + LANE - 1) // LANE) * LANE)
    w3p = jnp.zeros((hidden, n_pad), jnp.bfloat16).at[:, :action_size].set(w3)
    b3p = jnp.zeros((1, n_pad), jnp.float32).at[:, :action_size].set(b3)
    return (w1, b1, w2, b2, w3p, b3p)


def reference_forward(x, params, action_size, out_dtype=jnp.bfloat16):
    """Same math in plain JAX (identical bf16 quantization, f32 accumulation)."""
    w1, b1, w2, b2, w3p, b3p = params
    xb = x.astype(jnp.bfloat16)
    h1 = jnp.maximum(
        jnp.dot(xb, w1, preferred_element_type=jnp.float32) + b1, 0.0
    ).astype(jnp.bfloat16)
    h2 = jnp.maximum(
        jnp.dot(h1, w2, preferred_element_type=jnp.float32) + b2, 0.0
    ).astype(jnp.bfloat16)
    out = jnp.dot(h2, w3p, preferred_element_type=jnp.float32) + b3p
    return out.astype(out_dtype)[:, :action_size]


if __name__ == "__main__":
    state_size = 16
    action_size = 8
    batch = 8

    key = jax.random.PRNGKey(0)
    k_x, k_p = jax.random.split(key)
    x = jax.random.normal(k_x, (batch, state_size), jnp.float32)
    params = init_params(k_p, state_size, action_size)

    out = dqn_forward(x, params, action_size)
    jax.block_until_ready(out)

    ref = reference_forward(x, params, action_size, out_dtype=out.dtype)
    assert out.shape == (batch, action_size), out.shape
    err = float(jnp.max(jnp.abs(out.astype(jnp.float32) - ref.astype(jnp.float32))))
    assert jnp.allclose(
        out.astype(jnp.float32), ref.astype(jnp.float32), atol=2e-2, rtol=2e-2
    ), err

    print("KERNEL_OK")
</pallas_src>

<mosaic_0001>
module attributes {stable_mosaic.version = 11 : i64} {
  func.func @dqn_kernel(%arg0: i32, %arg1: memref<8x16xf32, #tpu.memory_space<vmem>>, %arg2: memref<16x256xbf16, #tpu.memory_space<vmem>>, %arg3: memref<1x256xf32, #tpu.memory_space<vmem>>, %arg4: memref<256x256xbf16, #tpu.memory_space<vmem>>, %arg5: memref<1x256xf32, #tpu.memory_space<vmem>>, %arg6: memref<256x128xbf16, #tpu.memory_space<vmem>>, %arg7: memref<1x128xf32, #tpu.memory_space<vmem>>, %arg8: memref<8x128xbf16, #tpu.memory_space<vmem>>) attributes {dimension_semantics = [#tpu.dimension_semantics<parallel>], iteration_bounds = array<i64: 1>, scalar_prefetch = 0 : i64, scratch_operands = 0 : i64, tpu.core_type = #tpu.core_type<tc>, window_params = [{transform_indices = @transform_0, window_bounds = array<i64: 8, 16>}, {pipeline_mode = #tpu.pipeline_mode<synchronous>, transform_indices = @transform_1, window_bounds = array<i64: 16, 256>}, {pipeline_mode = #tpu.pipeline_mode<synchronous>, transform_indices = @transform_2, window_bounds = array<i64: 1, 256>}, {pipeline_mode = #tpu.pipeline_mode<synchronous>, transform_indices = @transform_3, window_bounds = array<i64: 256, 256>}, {pipeline_mode = #tpu.pipeline_mode<synchronous>, transform_indices = @transform_4, window_bounds = array<i64: 1, 256>}, {pipeline_mode = #tpu.pipeline_mode<synchronous>, transform_indices = @transform_5, window_bounds = array<i64: 256, 128>}, {pipeline_mode = #tpu.pipeline_mode<synchronous>, transform_indices = @transform_6, window_bounds = array<i64: 1, 128>}, {transform_indices = @transform_7, window_bounds = array<i64: 8, 128>}]} {
    %c0 = arith.constant 0 : index
    %c0_0 = arith.constant 0 : index
    %0 = vector.load %arg1[%c0, %c0_0] : memref<8x16xf32, #tpu.memory_space<vmem>>, vector<8x16xf32>
    %1 = arith.truncf %0 : vector<8x16xf32> to vector<8x16xbf16>
    %c0_1 = arith.constant 0 : index
    %c0_2 = arith.constant 0 : index
    %2 = vector.load %arg2[%c0_1, %c0_2] : memref<16x256xbf16, #tpu.memory_space<vmem>>, vector<16x256xbf16>
    %cst = arith.constant dense<0.000000e+00> : vector<8x256xf32>
    %3 = tpu.matmul %1, %2, %cst {dimension_numbers = #tpu.dot_dimension_numbers<[1], [0], [0], [1], [0, 0, 1, 1], [], []>} : vector<8x16xbf16>, vector<16x256xbf16>, vector<8x256xf32> -> vector<8x256xf32>
    %c0_3 = arith.constant 0 : index
    %c0_4 = arith.constant 0 : index
    %4 = vector.load %arg3[%c0_3, %c0_4] : memref<1x256xf32, #tpu.memory_space<vmem>>, vector<1x256xf32>
    %5 = vector.broadcast %4 : vector<1x256xf32> to vector<8x256xf32>
    %6 = arith.addf %3, %5 : vector<8x256xf32>
    %cst_5 = arith.constant 0.000000e+00 : f32
    %7 = vector.broadcast %cst_5 : f32 to vector<8x256xf32>
    %8 = arith.maximumf %6, %7 : vector<8x256xf32>
    %9 = arith.truncf %8 : vector<8x256xf32> to vector<8x256xbf16>
    %c0_6 = arith.constant 0 : index
    %c0_7 = arith.constant 0 : index
    %10 = vector.load %arg4[%c0_6, %c0_7] : memref<256x256xbf16, #tpu.memory_space<vmem>>, vector<256x256xbf16>
    %cst_8 = arith.constant dense<0.000000e+00> : vector<8x256xf32>
    %11 = tpu.matmul %9, %10, %cst_8 {dimension_numbers = #tpu.dot_dimension_numbers<[1], [0], [0], [1], [0, 0, 1, 1], [], []>} : vector<8x256xbf16>, vector<256x256xbf16>, vector<8x256xf32> -> vector<8x256xf32>
    %c0_9 = arith.constant 0 : index
    %c0_10 = arith.constant 0 : index
    %12 = vector.load %arg5[%c0_9, %c0_10] : memref<1x256xf32, #tpu.memory_space<vmem>>, vector<1x256xf32>
    %13 = vector.broadcast %12 : vector<1x256xf32> to vector<8x256xf32>
    %14 = arith.addf %11, %13 : vector<8x256xf32>
    %cst_11 = arith.constant 0.000000e+00 : f32
    %15 = vector.broadcast %cst_11 : f32 to vector<8x256xf32>
    %16 = arith.maximumf %14, %15 : vector<8x256xf32>
    %17 = arith.truncf %16 : vector<8x256xf32> to vector<8x256xbf16>
    %c0_12 = arith.constant 0 : index
    %c0_13 = arith.constant 0 : index
    %18 = vector.load %arg6[%c0_12, %c0_13] : memref<256x128xbf16, #tpu.memory_space<vmem>>, vector<256x128xbf16>
    %cst_14 = arith.constant dense<0.000000e+00> : vector<8x128xf32>
    %19 = tpu.matmul %17, %18, %cst_14 {dimension_numbers = #tpu.dot_dimension_numbers<[1], [0], [0], [1], [0, 0, 1, 1], [], []>} : vector<8x256xbf16>, vector<256x128xbf16>, vector<8x128xf32> -> vector<8x128xf32>
    %c0_15 = arith.constant 0 : index
    %c0_16 = arith.constant 0 : index
    %20 = vector.load %arg7[%c0_15, %c0_16] : memref<1x128xf32, #tpu.memory_space<vmem>>, vector<1x128xf32>
    %21 = vector.broadcast %20 : vector<1x128xf32> to vector<8x128xf32>
    %22 = arith.addf %19, %21 : vector<8x128xf32>
    %23 = arith.truncf %22 : vector<8x128xf32> to vector<8x128xbf16>
    %c0_17 = arith.constant 0 : index
    %c0_18 = arith.constant 0 : index
    %24 = vector.load %arg8[%c0_17, %c0_18] : memref<8x128xbf16, #tpu.memory_space<vmem>>, vector<8x128xbf16>
    tpu.vector_store %arg8[%c0_17, %c0_18], %23 {strides = array<i32>} : memref<8x128xbf16, #tpu.memory_space<vmem>>, vector<8x128xbf16>,
    return
  }
  func.func @transform_0(%arg0: i32) -> (i32, i32) {
    %c0_i32 = arith.constant 0 : i32
    %c0_i32_0 = arith.constant 0 : i32
    return %arg0, %c0_i32 : i32, i32
  }
  func.func @transform_1(%arg0: i32) -> (i32, i32) {
    %c0_i32 = arith.constant 0 : i32
    %c0_i32_0 = arith.constant 0 : i32
    %c0_i32_1 = arith.constant 0 : i32
    return %c0_i32, %c0_i32_0 : i32, i32
  }
  func.func @transform_2(%arg0: i32) -> (i32, i32) {
    %c0_i32 = arith.constant 0 : i32
    %c0_i32_0 = arith.constant 0 : i32
    %c0_i32_1 = arith.constant 0 : i32
    return %c0_i32, %c0_i32_0 : i32, i32
  }
  func.func @transform_3(%arg0: i32) -> (i32, i32) {
    %c0_i32 = arith.constant 0 : i32
    %c0_i32_0 = arith.constant 0 : i32
    %c0_i32_1 = arith.constant 0 : i32
    return %c0_i32, %c0_i32_0 : i32, i32
  }
  func.func @transform_4(%arg0: i32) -> (i32, i32) {
    %c0_i32 = arith.constant 0 : i32
    %c0_i32_0 = arith.constant 0 : i32
    %c0_i32_1 = arith.constant 0 : i32
    return %c0_i32, %c0_i32_0 : i32, i32
  }
  func.func @transform_5(%arg0: i32) -> (i32, i32) {
    %c0_i32 = arith.constant 0 : i32
    %c0_i32_0 = arith.constant 0 : i32
    %c0_i32_1 = arith.constant 0 : i32
    return %c0_i32, %c0_i32_0 : i32, i32
  }
  func.func @transform_6(%arg0: i32) -> (i32, i32) {
    %c0_i32 = arith.constant 0 : i32
    %c0_i32_0 = arith.constant 0 : i32
    %c0_i32_1 = arith.constant 0 : i32
    return %c0_i32, %c0_i32_0 : i32, i32
  }
  func.func @transform_7(%arg0: i32) -> (i32, i32) {
    %c0_i32 = arith.constant 0 : i32
    %c0_i32_0 = arith.constant 0 : i32
    return %arg0, %c0_i32 : i32, i32
  }
}

</mosaic_0001>

<bundles_post_ra>
// kernel: tpu_custom_call.1
= control target key start
LH: loop header
LB: loop body
LE: loop exit
PB: predicated region body
PF: predicated region fallthrough
CT: control target
= control target key end

     0   :  { %12 = vsyncpa [#allocation3], 0  ;;  %s1080_s0 = inlined_call_operand.hbm [shape: f32[8,16], index: 0, kind: input, shape index: {}]   ;;  %s1081_s1 = inlined_call_operand.hbm [shape: bf16[16,256], index: 1, kind: input, shape index: {}]   ;;  %s1082_s2 = inlined_call_operand.hbm [shape: f32[1,256], index: 2, kind: input, shape index: {}]   ;;  %s1083_s3 = inlined_call_operand.hbm [shape: bf16[256,256], index: 3, kind: input, shape index: {}]   ;;  %s1084_s4 = inlined_call_operand.vmem [shape: f32[1,256], index: 4, kind: input, shape index: {}]   ;;  %s1085_s5 = inlined_call_operand.hbm [shape: bf16[256,128], index: 5, kind: input, shape index: {}]   ;;  %s1086_s6 = inlined_call_operand.vmem [shape: f32[1,128], index: 6, kind: input, shape index: {}]   ;;  %s1087_s7 = inlined_call_operand.hbm [shape: bf16[8,128], index: 7, kind: output, shape index: {}]  }
   0x1   :  { %13 = vsyncpa [#allocation6], 0 }
   0x2   :  { %14 = vsyncpa [#allocation9], 0  ;;  %s31_s26 = sshll.u32 %s1081_s1, 4  ;;  %s32_s26 = int_to_ptr.hbm [resolvable:$true] %s31_s26 }
   0x3   :  { %15 = vsyncpa [#allocation4], 0  ;;  %s1004_s27 = smov [#allocation5]   ;;  %s55_s8 = sshll.u32 %s1083_s3, 4  ;;  %s56_s8 = int_to_ptr.hbm [resolvable:$true] %s55_s8 }
   0x4   :  { %s33_s28 = sshll.u32 %s1004_s27, 4  ;;  %s1005_s9 = smov 128   ;;  %s34_s28 = int_to_ptr.vmem [resolvable:$true] %s33_s28 }
   0x5   :  { %s1006_s10 = smov 8   ;;  %s1007_s11 = smov [#allocation8]  }
   0x6   :  { %39 = dma.hbm_to_vmem [thread:$0]  %s32_s26, 256, %s34_s28, [#allocation6], %s1005_s9, %s1005_s9, %s1006_s10  }
   0x7   :  { %s57_s12 = sshll.u32 %s1007_s11, 4  ;;  %s21_s15 = sshll.u32 %s1080_s0, 4  ;;  %s58_s12 = int_to_ptr.vmem [resolvable:$true] %s57_s12  ;;  %s22_s15 = int_to_ptr.hbm [resolvable:$true] %s21_s15 }
   0x8   :  { %63 = dma.hbm_to_vmem [thread:$0]  %s56_s8, 4096, %s58_s12, [#allocation9], %s1005_s9, %s1005_s9, %s1006_s10  }
   0x9   :  { %s45_s17 = sshll.u32 %s1082_s2, 4  ;;  %s1008_s18 = smov [#allocation2]   ;;  %s46_s17 = int_to_ptr.hbm [resolvable:$true] %s45_s17 }
   0xa   :  { %s23_s19 = sshll.u32 %s1008_s18, 4  ;;  %s1009_s3 = smov [#allocation7]   ;;  %s24_s19 = int_to_ptr.vmem [resolvable:$true] %s23_s19 }
   0xb   :  { %26 = dma.hbm_to_vmem [thread:$0]  %s22_s15, 128, %s24_s19, [#allocation3]  }
   0xc   :  { %s47_s20 = sshll.u32 %s1009_s3, 4  ;;  %s70_s23 = sshll.u32 %s1085_s5, 4  ;;  %s48_s20 = int_to_ptr.vmem [resolvable:$true] %s47_s20  ;;  %s71_s23 = int_to_ptr.hbm [resolvable:$true] %s70_s23 }
   0xd   :  { %50 = dma.hbm_to_vmem [thread:$0]  %s46_s17, 32, %s48_s20, [#allocation6]  }
   0xe   :  { %s1010_s0 = smov [#allocation10]   ;;  %s1011_s25 = smov 64  }
   0xf   :  { %s72_s24 = sshll.u32 %s1010_s0, 4  ;;  %s1012_s26 = smov 4   ;;  %s73_s24 = int_to_ptr.vmem [resolvable:$true] %s72_s24 }
  0x10   :  { %78 = dma.hbm_to_vmem [thread:$0]  %s71_s23, 2048, %s73_s24, [#allocation9], %s1011_s25, %s1011_s25, %s1012_s26  }
  0x11   :  { %996 = dma.done.wait [#allocation3], 128  }
  0x12   :  { %997 = vsyncadd [#allocation3], 4294967168 }
  0x13   :  { %998 = dma.done.wait [#allocation6], 288  }
  0x14   :  { %999 = vsyncadd [#allocation6], 4294967008 }
  0x15   :  { %1000 = dma.done.wait [#allocation9], 6144  }
  0x16   :  { %1001 = vsyncadd [#allocation9], 4294961152  ;;  %v591_v0 = vld [vmem:[#allocation5] sm:$0xf]  ;;  %v792_v1 = vld [vmem:[#allocation5 + $0x4] sm:$0xf0] }
  0x17   :  { %v791_v2 = vld [vmem:[#allocation5 + $0x4] sm:$0xf]  ;;  %v592_v3 = vor.u32 %v792_v1, %v591_v0  ;;  %v593_v4 = vld [vmem:[#allocation5 + $0x8] sm:$0xf0]  ;;  %v102_v5 = vld [vmem:[#allocation2] sm:$0xff]  ;;  %vm122_vm0 = vcmask 130048  }
  0x18   :  { %v657_v6 = vld [vmem:[#allocation8 + $0x70] sm:$0xf]  ;;  %v596_v7 = vor.u32 %v791_v2, %v593_v4  ;;  %v103_v8 = vpack.c.bf16 %v102_v5, %v102_v5  ;;  %v808_v9 = vld [vmem:[#allocation8 + $0x74] sm:$0xf0]  ;;  %v807_v14 = vld [vmem:[#allocation8 + $0x74] sm:$0xf] }
  0x19   :  { %v721_v10 = vld [vmem:[#allocation8 + $0xf0] sm:$0xf]  ;;  %v824_v11 = vld [vmem:[#allocation8 + $0xf4] sm:$0xf0]  ;;  %133 = vmatpush.bf16.msra.mxu0 %v592_v3  ;;  %v658_v12 = vor.u32 %v808_v9, %v657_v6  ;;  %v659_v15 = vld [vmem:[#allocation8 + $0x78] sm:$0xf0] }
  0x1a   :  { %v722_v13 = vor.u32 %v824_v11, %v721_v10  ;;  %v823_v16 = vld [vmem:[#allocation8 + $0xf4] sm:$0xf]  ;;  %146 = vmatpush.bf16.msra.mxu1 %v596_v7  ;;  %v662_v17 = vor.u32 %v807_v14, %v659_v15  ;;  %v723_v18 = vld [vmem:[#allocation8 + $0xf8] sm:$0xf0]  ;;  %v649_v19 = vld [vmem:[#allocation8 + $0x60] sm:$0xf] }
  0x1b   :  { %v806_v20 = vld [vmem:[#allocation8 + $0x64] sm:$0xf0]  ;;  %354 = vmatpush.bf16.msra.mxu2 %v658_v12  ;;  %v726_v21 = vor.u32 %v823_v16, %v723_v18  ;;  %v713_v23 = vld [vmem:[#allocation8 + $0xe0] sm:$0xf]  ;;  %v805_v25 = vld [vmem:[#allocation8 + $0x64] sm:$0xf] }
  0x1c   :  { %367 = vmatpush.bf16.msra.mxu3 %v722_v13  ;;  %v650_v22 = vor.u32 %v806_v20, %v649_v19  ;;  %v822_v24 = vld [vmem:[#allocation8 + $0xe4] sm:$0xf0]  ;;  %597 = vmatmul.msk.bf16.vlgmr.msra.gmra.mxu0 %vm122_vm0, %v103_v8  ;;  %v651_v27 = vld [vmem:[#allocation8 + $0x68] sm:$0xf0]  ;;  %v821_v28 = vld [vmem:[#allocation8 + $0xe4] sm:$0xf] }
  0x1d   :  { %v714_v26 = vor.u32 %v822_v24, %v713_v23  ;;  %v715_v29 = vld [vmem:[#allocation8 + $0xe8] sm:$0xf0]  ;;  %598 = vmatmul.msk.bf16.vlgmr.msra.gmra.mxu1 %vm122_vm0, %v103_v8  ;;  %380 = vmatpush.bf16.msrb.mxu0 %v662_v17  ;;  %v654_v30 = vor.u32 %v805_v25, %v651_v27  ;;  %v641_v31 = vld [vmem:[#allocation8 + $0x50] sm:$0xf]  ;;  %v804_v32 = vld [vmem:[#allocation8 + $0x54] sm:$0xf0] }
  0x1e   :  { %v705_v33 = vld [vmem:[#allocation8 + $0xd0] sm:$0xf]  ;;  %393 = vmatpush.bf16.msrb.mxu1 %v726_v21  ;;  %v718_v34 = vor.u32 %v821_v28, %v715_v29  ;;  %v820_v35 = vld [vmem:[#allocation8 + $0xd4] sm:$0xf0]  ;;  %v803_v36 = vld [vmem:[#allocation8 + $0x54] sm:$0xf]  ;;  %v642_v38 = vor.u32 %v804_v32, %v641_v31 }
  0x1f   :  { %v643_v37 = vld [vmem:[#allocation8 + $0x58] sm:$0xf0]  ;;  %355 = vmatpush.bf16.msra.mxu2 %v650_v22  ;;  %v706_v39 = vor.u32 %v820_v35, %v705_v33  ;;  %v819_v40 = vld [vmem:[#allocation8 + $0xd4] sm:$0xf]  ;;  %v633_v42 = vld [vmem:[#allocation8 + $0x40] sm:$0xf] }
  0x20   :  { %368 = vmatpush.bf16.msra.mxu3 %v714_v26  ;;  %v707_v41 = vld [vmem:[#allocation8 + $0xd8] sm:$0xf0]  ;;  %v802_v43 = vld [vmem:[#allocation8 + $0x44] sm:$0xf0]  ;;  %v697_v44 = vld [vmem:[#allocation8 + $0xc0] sm:$0xf]  ;;  %v646_v46 = vor.u32 %v803_v36, %v643_v37 }
  0x21   :  { %v818_v45 = vld [vmem:[#allocation8 + $0xc4] sm:$0xf0]  ;;  %381 = vmatpush.bf16.msrb.mxu0 %v654_v30  ;;  %v710_v47 = vor.u32 %v819_v40, %v707_v41  ;;  %v801_v48 = vld [vmem:[#allocation8 + $0x44] sm:$0xf]  ;;  %v635_v49 = vld [vmem:[#allocation8 + $0x48] sm:$0xf0]  ;;  %v634_v50 = vor.u32 %v802_v43, %v633_v42 }
  0x22   :  { %394 = vmatpush.bf16.msrb.mxu1 %v718_v34  ;;  %v698_v51 = vor.u32 %v818_v45, %v697_v44  ;;  %v817_v52 = vld [vmem:[#allocation8 + $0xc4] sm:$0xf]  ;;  %v699_v53 = vld [vmem:[#allocation8 + $0xc8] sm:$0xf0]  ;;  %v625_v54 = vld [vmem:[#allocation8 + $0x30] sm:$0xf]  ;;  %v638_v58 = vor.u32 %v801_v48, %v635_v49 }
  0x23   :  { %356 = vmatpush.bf16.msra.mxu2 %v642_v38  ;;  %v800_v55 = vld [vmem:[#allocation8 + $0x34] sm:$0xf0]  ;;  %v689_v56 = vld [vmem:[#allocation8 + $0xb0] sm:$0xf]  ;;  %v702_v59 = vor.u32 %v817_v52, %v699_v53  ;;  %v799_v60 = vld [vmem:[#allocation8 + $0x34] sm:$0xf] }
  0x24   :  { %369 = vmatpush.bf16.msra.mxu3 %v706_v39  ;;  %v816_v57 = vld [vmem:[#allocation8 + $0xb4] sm:$0xf0]  ;;  %v627_v61 = vld [vmem:[#allocation8 + $0x38] sm:$0xf0]  ;;  %v815_v62 = vld [vmem:[#allocation8 + $0xb4] sm:$0xf]  ;;  %v626_v63 = vor.u32 %v800_v55, %v625_v54 }
  0x25   :  { %382 = vmatpush.bf16.msrb.mxu0 %v646_v46  ;;  %v690_v0 = vor.u32 %v816_v57, %v689_v56  ;;  %v691_v1 = vld [vmem:[#allocation8 + $0xb8] sm:$0xf0]  ;;  %v617_v2 = vld [vmem:[#allocation8 + $0x20] sm:$0xf]  ;;  %v798_v3 = vld [vmem:[#allocation8 + $0x24] sm:$0xf0]  ;;  %v630_v6 = vor.u32 %v799_v60, %v627_v61 }
  0x26   :  { %395 = vmatpush.bf16.msrb.mxu1 %v710_v47  ;;  %v681_v4 = vld [vmem:[#allocation8 + $0xa0] sm:$0xf]  ;;  %v814_v5 = vld [vmem:[#allocation8 + $0xa4] sm:$0xf0]  ;;  %v694_v7 = vor.u32 %v815_v62, %v691_v1  ;;  %v797_v8 = vld [vmem:[#allocation8 + $0x24] sm:$0xf]  ;;  %v618_v10 = vor.u32 %v798_v3, %v617_v2 }
  0x27   :  { %357 = vmatpush.bf16.msra.mxu2 %v634_v50  ;;  %v619_v9 = vld [vmem:[#allocation8 + $0x28] sm:$0xf0]  ;;  %v682_v11 = vor.u32 %v814_v5, %v681_v4  ;;  %v813_v12 = vld [vmem:[#allocation8 + $0xa4] sm:$0xf]  ;;  %v609_v16 = vld [vmem:[#allocation8 + $0x10] sm:$0xf] }
  0x28   :  { %370 = vmatpush.bf16.msra.mxu3 %v698_v51  ;;  %v683_v13 = vld [vmem:[#allocation8 + $0xa8] sm:$0xf0]  ;;  %v622_v14 = vor.u32 %v797_v8, %v619_v9  ;;  %v796_v17 = vld [vmem:[#allocation8 + $0x14] sm:$0xf0]  ;;  %v673_v18 = vld [vmem:[#allocation8 + $0x90] sm:$0xf] }
  0x29   :  { %383 = vmatpush.bf16.msrb.mxu0 %v638_v58  ;;  %v686_v15 = vor.u32 %v813_v12, %v683_v13  ;;  %v610_v19 = vor.u32 %v796_v17, %v609_v16  ;;  %v812_v20 = vld [vmem:[#allocation8 + $0x94] sm:$0xf0]  ;;  %v795_v21 = vld [vmem:[#allocation8 + $0x14] sm:$0xf]  ;;  %v611_v22 = vld [vmem:[#allocation8 + $0x18] sm:$0xf0] }
  0x2a   :  { %396 = vmatpush.bf16.msrb.mxu1 %v702_v59  ;;  %v674_v23 = vor.u32 %v812_v20, %v673_v18  ;;  %v614_v24 = vor.u32 %v795_v21, %v611_v22  ;;  %v811_v25 = vld [vmem:[#allocation8 + $0x94] sm:$0xf]  ;;  %v675_v26 = vld [vmem:[#allocation8 + $0x98] sm:$0xf0]  ;;  %v601_v28 = vld [vmem:[#allocation8] sm:$0xf] }
  0x2b   :  { %358 = vmatpush.bf16.msra.mxu2 %v626_v63  ;;  %v678_v27 = vor.u32 %v811_v25, %v675_v26  ;;  %v794_v29 = vld [vmem:[#allocation8 + $0x4] sm:$0xf0]  ;;  %v665_v30 = vld [vmem:[#allocation8 + $0x80] sm:$0xf]  ;;  %v793_v33 = vld [vmem:[#allocation8 + $0x4] sm:$0xf] }
  0x2c   :  { %371 = vmatpush.bf16.msra.mxu3 %v690_v0  ;;  %v602_v31 = vor.u32 %v794_v29, %v601_v28  ;;  %v810_v32 = vld [vmem:[#allocation8 + $0x84] sm:$0xf0]  ;;  %v603_v34 = vld [vmem:[#allocation8 + $0x8] sm:$0xf0]  ;;  %v809_v37 = vld [vmem:[#allocation8 + $0x84] sm:$0xf] }
  0x2d   :  { %384 = vmatpush.bf16.msrb.mxu0 %v630_v6  ;;  %v666_v35 = vor.u32 %v810_v32, %v665_v30  ;;  %v606_v36 = vor.u32 %v793_v33, %v603_v34  ;;  %v667_v38 = vld [vmem:[#allocation8 + $0x88] sm:$0xf0]  ;;  %v840_v40 = vld [vmem:[#allocation10 + $0x78] sm:$0xff]  ;;  %v839_v42 = vld [vmem:[#allocation10 + $0x70] sm:$0xff]  ;;  %s1013_s28 = smov [#allocation11]   ;;  %s577_s9 = sshll.u32 %s1087_s7, 4  ;;  %s578_s9 = int_to_ptr.hbm [resolvable:$true] %s577_s9 }
  0x2e   :  { %397 = vmatpush.bf16.msrb.mxu1 %v694_v7  ;;  %v670_v39 = vor.u32 %v809_v37, %v667_v38  ;;  %v832_v41 = vld [vmem:[#allocation10 + $0x38] sm:$0xff]  ;;  %v831_v43 = vld [vmem:[#allocation10 + $0x30] sm:$0xff]  ;;  %v838_v44 = vld [vmem:[#allocation10 + $0x68] sm:$0xff]  ;;  %s575_s29 = sshll.u32 %s1013_s28, 4  ;;  %s576_s29 = int_to_ptr.vmem [resolvable:$true] %s575_s29 }
  0x2f   :  { %359 = vmatpush.bf16.msra.mxu2 %v618_v10  ;;  %v830_v45 = vld [vmem:[#allocation10 + $0x28] sm:$0xff]  ;;  %v837_v46 = vld [vmem:[#allocation10 + $0x60] sm:$0xff]  ;;  %v836_v48 = vld [vmem:[#allocation10 + $0x58] sm:$0xff] }
  0x30   :  { %372 = vmatpush.bf16.msra.mxu3 %v682_v11  ;;  %v829_v47 = vld [vmem:[#allocation10 + $0x20] sm:$0xff]  ;;  %v106_v49 = vld [vmem:[#allocation7] sm:$0x3]  ;;  %v835_v50 = vld [vmem:[#allocation10 + $0x50] sm:$0xff] }
  0x31   :  { %385 = vmatpush.bf16.msrb.mxu0 %v622_v14  ;;  %v108_v51 = vperm.slane %v106_v49, 0  ;;  %v109_v52 = vperm.slane %v106_v49, 1  ;;  %v828_v63 = vld [vmem:[#allocation10 + $0x18] sm:$0xff]  ;;  %v834_v0 = vld [vmem:[#allocation10 + $0x48] sm:$0xff]  ;;  %v827_v1 = vld [vmem:[#allocation10 + $0x10] sm:$0xff] }
  0x32   :  { %398 = vmatpush.bf16.msrb.mxu1 %v686_v15  ;;  %v833_v2 = vld [vmem:[#allocation10 + $0x40] sm:$0xff]  ;;  %v826_v3 = vld [vmem:[#allocation10 + $0x8] sm:$0xff] }
  0x33   :  { %360 = vmatpush.bf16.msra.mxu2 %v610_v19  ;;  %v825_v4 = vld [vmem:[#allocation10] sm:$0xff] }
  0x34   :  { %373 = vmatpush.bf16.msra.mxu3 %v674_v23  ;;  %v188_v5 = vld [vmem:[%s1084_s4] sm:$0x3] }
  0x35   :  { %386 = vmatpush.bf16.msrb.mxu0 %v614_v24  ;;  %v191_v6 = vperm.slane %v188_v5, 1  ;;  %v190_v11 = vperm.slane %v188_v5, 0  ;;  %v851_v25 = vld [vmem:[%s1086_s6] ss:$0 sm:$0xff] }
  0x36   :  { %399 = vmatpush.bf16.msrb.mxu1 %v678_v27 }
  0x37   :  { %361 = vmatpush.bf16.msra.mxu2 %v602_v31 }
  0x38   :  { %374 = vmatpush.bf16.msra.mxu3 %v666_v35 }
  0x39   :  { %387 = vmatpush.bf16.msrb.mxu0 %v606_v36 }
  0x3a   :  { %400 = vmatpush.bf16.msrb.mxu1 %v670_v39 }
  0x3b   :  { %542 = vmatpush.bf16.msrb.mxu2 %v832_v41 }
  0x3c   :  { %555 = vmatpush.bf16.msrb.mxu3 %v840_v40 }
  0x3f   :  { %543 = vmatpush.bf16.msrb.mxu2 %v831_v43 }
  0x40   :  { %556 = vmatpush.bf16.msrb.mxu3 %v839_v42 }
  0x43   :  { %544 = vmatpush.bf16.msrb.mxu2 %v830_v45 }
  0x44   :  { %557 = vmatpush.bf16.msrb.mxu3 %v838_v44 }
  0x47   :  { %545 = vmatpush.bf16.msrb.mxu2 %v829_v47 }
  0x48   :  { %558 = vmatpush.bf16.msrb.mxu3 %v837_v46 }
  0x4b   :  { %546 = vmatpush.bf16.msrb.mxu2 %v828_v63 }
  0x4c   :  { %559 = vmatpush.bf16.msrb.mxu3 %v836_v48 }
  0x4f   :  { %547 = vmatpush.bf16.msrb.mxu2 %v827_v1 }
  0x50   :  { %560 = vmatpush.bf16.msrb.mxu3 %v835_v50 }
  0x53   :  { %548 = vmatpush.bf16.msrb.mxu2 %v826_v3 }
  0x54   :  { %561 = vmatpush.bf16.msrb.mxu3 %v834_v0 }
  0x57   :  { %549 = vmatpush.bf16.msrb.mxu2 %v825_v4 }
  0x58   :  { %562 = vmatpush.bf16.msrb.mxu3 %v833_v2 }
  0x99   :  { %v135_v53 = vpop.f32.mrf.mxu0 }
  0x9a   :  { %v136_v54 = vadd.f32 %v135_v53, %v108_v51  ;;  %v148_v55 = vpop.f32.mrf.mxu1 }
  0x9b   :  { %v149_v56 = vadd.f32 %v148_v55, %v109_v52 }
  0x9c   :  { %v152_v57 = vmax.f32 %v136_v54, 0.0 }
  0x9d   :  { %v153_v58 = vmax.f32 %v149_v56, 0.0 }
  0x9e   :  { %v154_v59 = vpack.c.bf16 %v152_v57, %v152_v57 }
  0x9f   :  { %v155_v60 = vpack.c.bf16 %v153_v58, %v153_v58 }
  0xa0   :  { %362 = vmatmul.bf16.vlgmr.msra.gmra.mxu2 %v154_v59  ;;  %388 = vmatmul.bf16.vlgmr.msrb.gmra.mxu0 %v154_v59 }
  0xa1   :  { %375 = vmatmul.bf16.vlgmr.msra.gmra.mxu3 %v155_v60  ;;  %401 = vmatmul.bf16.vlgmr.msrb.gmra.mxu1 %v155_v60  ;;  %v137_v61 = vpop.f32.mrf.mxu0 }
  0xa2   :  { %v150_v62 = vpop.f32.mrf.mxu1 }
 0x11d   :  { %v389_v7 = vpop.f32.mrf.mxu0 }
 0x11e   :  { %v390_v8 = vadd.f32 %v389_v7, %v191_v6  ;;  %v402_v9 = vpop.f32.mrf.mxu1 }
 0x120   :  { %v403_v10 = vadd.f32 %v402_v9, %v390_v8 }
 0x122   :  { %v407_v12 = vmax.f32 %v403_v10, 0.0 }
 0x123   :  { %v363_v13 = vpop.f32.mrf.mxu2 }
 0x124   :  { %v409_v14 = vpack.c.bf16 %v407_v12, %v407_v12  ;;  %v364_v15 = vadd.f32 %v363_v13, %v190_v11  ;;  %v376_v16 = vpop.f32.mrf.mxu3 }
 0x125   :  { %v391_v17 = vpop.f32.mrf.mxu0 }
 0x126   :  { %v377_v18 = vadd.f32 %v376_v16, %v364_v15  ;;  %v404_v19 = vpop.f32.mrf.mxu1  ;;  %563 = vmatmul.bf16.vlgmr.msrb.gmra.mxu3 %v409_v14 }
 0x128   :  { %v406_v20 = vmax.f32 %v377_v18, 0.0 }
 0x12a   :  { %v408_v21 = vpack.c.bf16 %v406_v20, %v406_v20 }
 0x12b   :  { %v365_v22 = vpop.f32.mrf.mxu2 }
 0x12c   :  { %v378_v23 = vpop.f32.mrf.mxu3  ;;  %550 = vmatmul.bf16.vlgmr.msrb.gmra.mxu2 %v408_v21 }
 0x1a9   :  { %v564_v24 = vpop.f32.mrf.mxu3 }
 0x1af   :  { %v551_v26 = vpop.f32.mrf.mxu2 }
 0x1b0   :  { %v552_v27 = vadd.f32 %v851_v25, %v551_v26 }
 0x1b1   :  { %v566_v28 = vpop.f32.mrf.mxu3 }
 0x1b2   :  { %v565_v29 = vadd.f32 %v564_v24, %v552_v27 }
 0x1b4   :  { %v568_v30 = vpack.c.bf16 %v565_v29, %v565_v29 }
 0x1b6   :  { %569 = vst [vmem:[#allocation11] sm:$0xf] %v568_v30 }
 0x1b7   :  { %v553_v31 = vpop.f32.mrf.mxu2  ;;  %580 = dma.vmem_to_hbm [thread:$0]  %s576_s29, 64, %s578_s9, [#allocation4]  }
 0x1b8   :  { %1002 = dma.done.wait [#allocation4], 64  }
 0x1b9   :  { %1003 = vsyncadd [#allocation4], 4294967232 }
 0x1ba   :  { %585 = vsyncpa [#allocation3], 1 }
 0x1bb   :  { %586 = vsyncpa [#allocation6], 1 }
 0x1bc   :  { %587 = vsyncpa [#allocation9], 1 }
 0x1bd   :  { %588 = vsyncpa [#allocation4], 1 }

</bundles_post_ra>
